<compile_context>
chip_gen: v6e
topology: v6e:2x2x1
jax: 0.10.0
libtpu: 0.0.40
codegen_flags: <defaults>
</compile_context>

<pallas_src>
import functools

import jax
import jax.numpy as jnp
from jax.experimental import pallas as pl
from jax.experimental.pallas import tpu as pltpu


# --------------------------------------------------------------------------
# Config helpers
# --------------------------------------------------------------------------

def _default_compute_dtype():
    """MXU-operand dtype.  bf16 on every TPU generation (the v5e MXU is
    natively bf16; f32 matmuls are emulated with multiple passes).
    Accumulation stays f32.  Use compute_dtype=jnp.float32 for strict f32."""
    return jnp.bfloat16


def _num_tensorcores():
    """2 TensorCores per chip on v7x, otherwise 1 (best-effort string match)."""
    try:
        kind = jax.devices()[0].device_kind.lower()
    except Exception:
        return 1
    return 2 if ("v7" in kind or "7x" in kind) else 1


def _pair_budget_bytes():
    """Per-step budget for the f32 pair-chunk intermediate (j-chunk tiling)."""
    try:
        kind = jax.devices()[0].device_kind.lower()
    except Exception:
        return 8 << 20
    if "v7" in kind or "7x" in kind:
        return 8 << 20            # v7x: 64 MiB VMEM total -> keep it tight
    return 24 << 20               # v5e / v6e: 128 MiB VMEM


def _pick_block_b(B, N, H, compute_dtype, num_cores=1):
    """Batches per grid step.

    * Sublane alignment: block_b*N aligned to 16 rows for 16-bit operands
      (8 rows for f32), unless block_b == B (full-extent block is always ok).
    * Tiny work (< ~1e6 pair elements per step): collapse to as few steps as
      possible -- each step costs ~0.35us of pipeline overhead which dwarfs
      the compute at small shapes.
    * Otherwise keep >= 2 steps per TensorCore so the BlockSpec pipeline can
      overlap the z DMA with compute after megacore sharding.
    """
    sub = 8 * max(1, 4 // jnp.dtype(compute_dtype).itemsize)

    def fits(d):
        # f32 intermediates at the minimum j-chunk (tj=1): a_lin, c_lin,
        # r_sum accumulator, one pair slice.
        return d * N * H * 4 * 4 <= 16 * 1024 * 1024

    cands = [d for d in range(1, B + 1)
             if B % d == 0 and ((d * N) % sub == 0 or d == B) and fits(d)]
    if not cands:
        aligned = [d for d in range(1, B + 1) if B % d == 0 and (d * N) % 8 == 0]
        return min(aligned) if aligned else B

    biggest = max(cands)
    if biggest * N * N * H < 1_000_000:      # launch/step-overhead bound
        return biggest
    min_steps = 2 * max(num_cores, 1)
    multi = [d for d in cands if B // d >= min_steps]
    return max(multi) if multi else biggest


def _pick_tj(block_b, N, H, budget_bytes):
    """Largest divisor of N such that the f32 pair chunk fits the budget."""
    best = 1
    for tj in range(1, N + 1):
        if N % tj == 0 and block_b * N * tj * H * 4 <= budget_bytes:
            best = tj
    return best


def _vmem_bytes_estimate(block_b, N, D, H, Op, tj, compute_dtype):
    cd = jnp.dtype(compute_dtype).itemsize
    m_blk = block_b * N
    io = 2 * m_blk * D * cd + 2 * m_blk * Op * 4                 # z in, out (x2 buf)
    w = 2 * (2 * D * H * cd + H * Op * cd + (2 * H + Op) * 4)    # weights/biases
    inter = (2 * m_blk * H + block_b * N * H + block_b * N * tj * H) * 4
    return io + w + inter


# --------------------------------------------------------------------------
# Kernel
# --------------------------------------------------------------------------

def prototype_kernel(z_ref, w1_ref, w2_ref, br_ref, wa_ref, ba_ref, out_ref,
                     *, block_b, n, h, tj, compute_dtype):
    # z_ref:   (block_b*N, D)   compute dtype (bf16 or f32)
    # w1_ref:  (D, H)           W_r[:, :D].T, compute dtype
    # w2_ref:  (D, H)           W_r[:, D:].T, compute dtype
    # br_ref:  (1, H)           b_r, f32
    # wa_ref:  (H, Op)          W_a.T zero-padded to Op lanes, compute dtype
    # ba_ref:  (1, Op)          b_a zero-padded to Op lanes, f32
    # out_ref: (block_b*N, Op)  f32, lane-dense (Op multiple of 128)
    m = block_b * n
    z = z_ref[...]

    # Two separate dots (no mid-tile lane split of a merged (m, 2H) result).
    # b_r is folded into the z_i half once -> exactly one bias add per pair.
    a_lin = (jnp.dot(z, w1_ref[...], preferred_element_type=jnp.float32)
             + br_ref[...])                                   # (m, H) f32
    c_lin = jnp.dot(z, w2_ref[...],
                    preferred_element_type=jnp.float32)       # (m, H) f32

    a = a_lin.reshape(block_b, n, 1, h)                       # z_i term (+bias)
    c = c_lin.reshape(block_b, n, h)                          # z_j term

    # pair[b,i,j,:] = a[b,i] + c[b,j]; relu; sum over j.  Tiled over j-chunks
    # of size tj so peak VMEM is bounded for large N (mandatory on v7x).
    # TODO(synk): at large N with H=64 (<128 lanes) this stage is only 50%
    # lane-occupied; pack two j-slices per 128-lane tile if it becomes
    # VALU-bound (irrelevant at N=8).
    n_chunks = n // tj
    if n_chunks == 1:
        r = jnp.maximum(a + c.reshape(block_b, 1, n, h), 0.0)
        r_sum = jnp.sum(r, axis=2)                            # (block_b, n, h)
    else:
        def body(jc, acc):
            c_blk = jax.lax.dynamic_slice_in_dim(c, jc * tj, tj, axis=1)
            r = jnp.maximum(a + c_blk.reshape(block_b, 1, tj, h), 0.0)
            return acc + jnp.sum(r, axis=2)
        r_sum = jax.lax.fori_loop(0, n_chunks, body,
                                  jnp.zeros((block_b, n, h), jnp.float32))

    # Second matmul also with compute-dtype operands, f32 accumulation.
    f = (jnp.dot(r_sum.reshape(m, h).astype(compute_dtype), wa_ref[...],
                 preferred_element_type=jnp.float32) + ba_ref[...])
    out_ref[...] = jnp.maximum(f, 0.0).astype(out_ref.dtype)


# --------------------------------------------------------------------------
# Wrappers
# --------------------------------------------------------------------------

def prepare_prototype_params(W_r, b_r, W_a, b_a, *, compute_dtype=None):
    """One-time weight prep (hoisted out of the hot path): split/transpose
    W_r, lane-pad W_a/b_a to a multiple of 128, cast MXU operands."""
    if compute_dtype is None:
        compute_dtype = _default_compute_dtype()
    f32 = jnp.float32
    H, twoD = W_r.shape
    D = twoD // 2
    O = W_a.shape[0]
    Op = ((O + 127) // 128) * 128

    w1 = W_r[:, :D].T.astype(compute_dtype)                               # (D, H)
    w2 = W_r[:, D:].T.astype(compute_dtype)                               # (D, H)
    br = b_r.astype(f32).reshape(1, H)                                    # (1, H)
    wa = (jnp.zeros((H, Op), f32).at[:, :O].set(W_a.T.astype(f32))
          .astype(compute_dtype))                                         # (H, Op)
    ba = jnp.zeros((1, Op), f32).at[0, :O].set(b_a.astype(f32))           # (1, Op)
    return (w1, w2, br, wa, ba)


def prototype_apply(z_t, w1, w2, br, wa, ba, *, out_dim, block_b=None, tj=None):
    """z_t: [B, N, D].  Params as produced by prepare_prototype_params."""
    B, N, D = z_t.shape
    H = w1.shape[1]
    Op = wa.shape[1]
    compute_dtype = w1.dtype

    if block_b is None:
        block_b = _pick_block_b(B, N, H, compute_dtype, _num_tensorcores())
    assert B % block_b == 0, (B, block_b)
    if tj is None:
        tj = _pick_tj(block_b, N, H, _pair_budget_bytes())
    assert N % tj == 0, (N, tj)

    m_blk = block_b * N
    z2 = z_t.reshape(B * N, D).astype(compute_dtype)

    kernel = functools.partial(prototype_kernel, block_b=block_b, n=N, h=H,
                               tj=tj, compute_dtype=compute_dtype)

    est = _vmem_bytes_estimate(block_b, N, D, H, Op, tj, compute_dtype)
    vmem_limit = int(min(max(2 * est, 32 << 20), 48 << 20))

    out = pl.pallas_call(
        kernel,
        out_shape=jax.ShapeDtypeStruct((B * N, Op), jnp.float32),
        grid_spec=pltpu.PrefetchScalarGridSpec(
            num_scalar_prefetch=0,
            grid=(B // block_b,),
            in_specs=[
                pl.BlockSpec((m_blk, D), lambda b: (b, 0)),
                pl.BlockSpec((D, H), lambda b: (0, 0)),     # VMEM-resident
                pl.BlockSpec((D, H), lambda b: (0, 0)),
                pl.BlockSpec((1, H), lambda b: (0, 0)),
                pl.BlockSpec((H, Op), lambda b: (0, 0)),
                pl.BlockSpec((1, Op), lambda b: (0, 0)),
            ],
            out_specs=pl.BlockSpec((m_blk, Op), lambda b: (b, 0)),
        ),
        compiler_params=pltpu.CompilerParams(
            dimension_semantics=("parallel",),
            vmem_limit_bytes=vmem_limit),
    )(z2, w1, w2, br, wa, ba)

    return out.reshape(B, N, Op)[..., :out_dim].astype(z_t.dtype)


def prototype_forward(z_t, W_r, b_r, W_a, b_a, *, compute_dtype=None,
                      block_b=None, tj=None):
    """Convenience wrapper matching the PyTorch module signature.  For hot
    loops, call prepare_prototype_params once and jit prototype_apply."""
    params = prepare_prototype_params(W_r, b_r, W_a, b_a,
                                      compute_dtype=compute_dtype)
    return prototype_apply(z_t, *params, out_dim=W_a.shape[0],
                           block_b=block_b, tj=tj)


def prototype_reference(z_t, W_r, b_r, W_a, b_a, compute_dtype=jnp.float32):
    """Pure-JAX mirror of the PyTorch forward (builds the full pair tensor).
    `compute_dtype` applies the same MXU-operand quantization as the kernel
    (both matmuls) so the comparison is apples-to-apples for bf16."""
    B, N, D = z_t.shape
    z = z_t.astype(compute_dtype).astype(jnp.float32)
    Wr = W_r.astype(compute_dtype).astype(jnp.float32)
    z_i = jnp.broadcast_to(z[:, :, None, :], (B, N, N, D))
    z_j = jnp.broadcast_to(z[:, None, :, :], (B, N, N, D))
    z_pair = jnp.concatenate([z_i, z_j], axis=-1).reshape(B * N * N, 2 * D)
    r = jnp.maximum(z_pair @ Wr.T + b_r, 0.0).reshape(B, N, N, -1)
    r_sum = r.sum(axis=2)
    Wa = W_a.astype(compute_dtype).astype(jnp.float32)
    r_sum_q = r_sum.astype(compute_dtype).astype(jnp.float32)
    return jnp.maximum(r_sum_q @ Wa.T + b_a, 0.0)


if __name__ == "__main__":
    input_dim, hidden_dim, output_dim = 30, 64, 30
    B, N, D = 2, 8, input_dim

    key = jax.random.PRNGKey(0)
    k1, k2, k3, k4, k5 = jax.random.split(key, 5)

    # Deterministic parameter init (uniform, PyTorch-Linear-like fan-in scaling).
    bound_r = 1.0 / (2 * input_dim) ** 0.5
    bound_a = 1.0 / hidden_dim ** 0.5
    W_r = jax.random.uniform(k1, (hidden_dim, 2 * input_dim), jnp.float32, -bound_r, bound_r)
    b_r = jax.random.uniform(k2, (hidden_dim,), jnp.float32, -bound_r, bound_r)
    W_a = jax.random.uniform(k3, (output_dim, hidden_dim), jnp.float32, -bound_a, bound_a)
    b_a = jax.random.uniform(k4, (output_dim,), jnp.float32, -bound_a, bound_a)

    z_t = jax.random.normal(k5, (B, N, D), jnp.float32)

    compute_dtype = _default_compute_dtype()

    # Hoisted weight prep: done once; only the jitted Pallas apply runs per step.
    params = prepare_prototype_params(W_r, b_r, W_a, b_a,
                                      compute_dtype=compute_dtype)
    fwd = jax.jit(functools.partial(prototype_apply, out_dim=output_dim))

    out = jax.block_until_ready(fwd(z_t, *params))

    ref = prototype_reference(z_t, W_r, b_r, W_a, b_a, compute_dtype=compute_dtype)
    tol = 2e-3 if jnp.dtype(compute_dtype) == jnp.dtype(jnp.bfloat16) else 1e-4
    assert out.shape == (B, N, output_dim)
    assert jnp.allclose(out, ref, atol=tol, rtol=tol), "mismatch vs reference"

    print("KERNEL_OK")
</pallas_src>

<mosaic_0001>
module attributes {stable_mosaic.version = 11 : i64} {
  func.func @prototype_kernel(%arg0: i32, %arg1: memref<16x30xbf16, #tpu.memory_space<vmem>>, %arg2: memref<30x64xbf16, #tpu.memory_space<vmem>>, %arg3: memref<30x64xbf16, #tpu.memory_space<vmem>>, %arg4: memref<1x64xf32, #tpu.memory_space<vmem>>, %arg5: memref<64x128xbf16, #tpu.memory_space<vmem>>, %arg6: memref<1x128xf32, #tpu.memory_space<vmem>>, %arg7: memref<16x128xf32, #tpu.memory_space<vmem>>) attributes {dimension_semantics = [#tpu.dimension_semantics<parallel>], iteration_bounds = array<i64: 1>, scalar_prefetch = 0 : i64, scratch_operands = 0 : i64, tpu.core_type = #tpu.core_type<tc>, window_params = [{transform_indices = @transform_0, window_bounds = array<i64: 16, 30>}, {pipeline_mode = #tpu.pipeline_mode<synchronous>, transform_indices = @transform_1, window_bounds = array<i64: 30, 64>}, {pipeline_mode = #tpu.pipeline_mode<synchronous>, transform_indices = @transform_2, window_bounds = array<i64: 30, 64>}, {pipeline_mode = #tpu.pipeline_mode<synchronous>, transform_indices = @transform_3, window_bounds = array<i64: 1, 64>}, {pipeline_mode = #tpu.pipeline_mode<synchronous>, transform_indices = @transform_4, window_bounds = array<i64: 64, 128>}, {pipeline_mode = #tpu.pipeline_mode<synchronous>, transform_indices = @transform_5, window_bounds = array<i64: 1, 128>}, {transform_indices = @transform_6, window_bounds = array<i64: 16, 128>}]} {
    %c0 = arith.constant 0 : index
    %c0_0 = arith.constant 0 : index
    %0 = vector.load %arg1[%c0, %c0_0] : memref<16x30xbf16, #tpu.memory_space<vmem>>, vector<16x30xbf16>
    %c0_1 = arith.constant 0 : index
    %c0_2 = arith.constant 0 : index
    %1 = vector.load %arg2[%c0_1, %c0_2] : memref<30x64xbf16, #tpu.memory_space<vmem>>, vector<30x64xbf16>
    %cst = arith.constant dense<0.000000e+00> : vector<16x64xf32>
    %2 = tpu.matmul %0, %1, %cst {dimension_numbers = #tpu.dot_dimension_numbers<[1], [0], [0], [1], [0, 0, 1, 1], [], []>} : vector<16x30xbf16>, vector<30x64xbf16>, vector<16x64xf32> -> vector<16x64xf32>
    %c0_3 = arith.constant 0 : index
    %c0_4 = arith.constant 0 : index
    %3 = vector.load %arg4[%c0_3, %c0_4] : memref<1x64xf32, #tpu.memory_space<vmem>>, vector<1x64xf32>
    %4 = vector.broadcast %3 : vector<1x64xf32> to vector<16x64xf32>
    %5 = arith.addf %2, %4 : vector<16x64xf32>
    %c0_5 = arith.constant 0 : index
    %c0_6 = arith.constant 0 : index
    %6 = vector.load %arg3[%c0_5, %c0_6] : memref<30x64xbf16, #tpu.memory_space<vmem>>, vector<30x64xbf16>
    %cst_7 = arith.constant dense<0.000000e+00> : vector<16x64xf32>
    %7 = tpu.matmul %0, %6, %cst_7 {dimension_numbers = #tpu.dot_dimension_numbers<[1], [0], [0], [1], [0, 0, 1, 1], [], []>} : vector<16x30xbf16>, vector<30x64xbf16>, vector<16x64xf32> -> vector<16x64xf32>
    %8 = vector.shape_cast %5 : vector<16x64xf32> to vector<2x8x1x64xf32>
    %9 = vector.shape_cast %7 : vector<16x64xf32> to vector<2x8x64xf32>
    %10 = vector.shape_cast %9 : vector<2x8x64xf32> to vector<2x1x8x64xf32>
    %11 = vector.broadcast %8 : vector<2x8x1x64xf32> to vector<2x8x8x64xf32>
    %12 = vector.broadcast %10 : vector<2x1x8x64xf32> to vector<2x8x8x64xf32>
    %13 = arith.addf %11, %12 : vector<2x8x8x64xf32>
    %cst_8 = arith.constant 0.000000e+00 : f32
    %14 = vector.broadcast %cst_8 : f32 to vector<2x8x8x64xf32>
    %15 = arith.maximumf %13, %14 : vector<2x8x8x64xf32>
    %cst_9 = arith.constant dense<0.000000e+00> : vector<2x8x64xf32>
    %16 = vector.multi_reduction <add>, %15, %cst_9 [2] : vector<2x8x8x64xf32> to vector<2x8x64xf32>
    %17 = vector.shape_cast %16 : vector<2x8x64xf32> to vector<16x64xf32>
    %18 = arith.truncf %17 : vector<16x64xf32> to vector<16x64xbf16>
    %c0_10 = arith.constant 0 : index
    %c0_11 = arith.constant 0 : index
    %19 = vector.load %arg5[%c0_10, %c0_11] : memref<64x128xbf16, #tpu.memory_space<vmem>>, vector<64x128xbf16>
    %cst_12 = arith.constant dense<0.000000e+00> : vector<16x128xf32>
    %20 = tpu.matmul %18, %19, %cst_12 {dimension_numbers = #tpu.dot_dimension_numbers<[1], [0], [0], [1], [0, 0, 1, 1], [], []>} : vector<16x64xbf16>, vector<64x128xbf16>, vector<16x128xf32> -> vector<16x128xf32>
    %c0_13 = arith.constant 0 : index
    %c0_14 = arith.constant 0 : index
    %21 = vector.load %arg6[%c0_13, %c0_14] : memref<1x128xf32, #tpu.memory_space<vmem>>, vector<1x128xf32>
    %22 = vector.broadcast %21 : vector<1x128xf32> to vector<16x128xf32>
    %23 = arith.addf %20, %22 : vector<16x128xf32>
    %cst_15 = arith.constant 0.000000e+00 : f32
    %24 = vector.broadcast %cst_15 : f32 to vector<16x128xf32>
    %25 = arith.maximumf %23, %24 : vector<16x128xf32>
    %c0_16 = arith.constant 0 : index
    %c0_17 = arith.constant 0 : index
    %26 = vector.load %arg7[%c0_16, %c0_17] : memref<16x128xf32, #tpu.memory_space<vmem>>, vector<16x128xf32>
    tpu.vector_store %arg7[%c0_16, %c0_17], %25 {strides = array<i32>} : memref<16x128xf32, #tpu.memory_space<vmem>>, vector<16x128xf32>,
    return
  }
  func.func @transform_0(%arg0: i32) -> (i32, i32) {
    %c0_i32 = arith.constant 0 : i32
    %c0_i32_0 = arith.constant 0 : i32
    return %arg0, %c0_i32 : i32, i32
  }
  func.func @transform_1(%arg0: i32) -> (i32, i32) {
    %c0_i32 = arith.constant 0 : i32
    %c0_i32_0 = arith.constant 0 : i32
    %c0_i32_1 = arith.constant 0 : i32
    return %c0_i32, %c0_i32_0 : i32, i32
  }
  func.func @transform_2(%arg0: i32) -> (i32, i32) {
    %c0_i32 = arith.constant 0 : i32
    %c0_i32_0 = arith.constant 0 : i32
    %c0_i32_1 = arith.constant 0 : i32
    return %c0_i32, %c0_i32_0 : i32, i32
  }
  func.func @transform_3(%arg0: i32) -> (i32, i32) {
    %c0_i32 = arith.constant 0 : i32
    %c0_i32_0 = arith.constant 0 : i32
    %c0_i32_1 = arith.constant 0 : i32
    return %c0_i32, %c0_i32_0 : i32, i32
  }
  func.func @transform_4(%arg0: i32) -> (i32, i32) {
    %c0_i32 = arith.constant 0 : i32
    %c0_i32_0 = arith.constant 0 : i32
    %c0_i32_1 = arith.constant 0 : i32
    return %c0_i32, %c0_i32_0 : i32, i32
  }
  func.func @transform_5(%arg0: i32) -> (i32, i32) {
    %c0_i32 = arith.constant 0 : i32
    %c0_i32_0 = arith.constant 0 : i32
    %c0_i32_1 = arith.constant 0 : i32
    return %c0_i32, %c0_i32_0 : i32, i32
  }
  func.func @transform_6(%arg0: i32) -> (i32, i32) {
    %c0_i32 = arith.constant 0 : i32
    %c0_i32_0 = arith.constant 0 : i32
    return %arg0, %c0_i32 : i32, i32
  }
}

</mosaic_0001>

<bundles_post_ra>
// kernel: prototype_apply.1
= control target key start
LH: loop header
LB: loop body
LE: loop exit
PB: predicated region body
PF: predicated region fallthrough
CT: control target
= control target key end

     0   :  { %11 = vsyncpa [#allocation3], 0  ;;  %s980_s0 = inlined_call_operand.vmem [shape: bf16[16,30], index: 0, kind: input, shape index: {}]   ;;  %s981_s1 = inlined_call_operand.vmem [shape: bf16[30,64], index: 1, kind: input, shape index: {}]   ;;  %s982_s2 = inlined_call_operand.hbm [shape: bf16[30,64], index: 2, kind: input, shape index: {}]   ;;  %s983_s3 = inlined_call_operand.vmem [shape: f32[1,64], index: 3, kind: input, shape index: {}]   ;;  %s984_s4 = inlined_call_operand.hbm [shape: bf16[64,128], index: 4, kind: input, shape index: {}]   ;;  %s985_s5 = inlined_call_operand.vmem [shape: f32[1,128], index: 5, kind: input, shape index: {}]   ;;  %s986_s6 = inlined_call_operand.hbm [shape: f32[16,128], index: 6, kind: output, shape index: {}]  }
   0x1   :  { %12 = vsyncpa [#allocation6], 0 }
   0x2   :  { %13 = vsyncpa [#allocation4], 0  ;;  %s828_s21 = smov [#allocation2]  }
   0x3   :  { %s23_s22 = sshll.u32 %s828_s21, 4  ;;  %s24_s22 = int_to_ptr.vmem [resolvable:$true] %s23_s22 }
   0x4   :  { %s770_s23 = scalar_lea.vmem %s24_s22, 256  ;;  %p775_p1 = scmp.lt.s32.totalorder %s24_s22, %s24_s22 }
   0x5   :  { %p771_p0 = scmp.ne.s32.totalorder %s24_s22, %s770_s23  ;;  %p776_p2 = scmp.lt.s32.totalorder %s770_s23, %s770_s23 }
   0x7   :  { %p777_p3 = por %p776_p2, %p775_p1 }
   0x9   :  { %p778_p4 = pnand %p777_p3, %p771_p0 }
   0xb   :  { %781 = shalt.err (!%p778_p4)
}
   0xc   :  { %s829_s24 = smov 64   ;;  %s830_s25 = smov 4  }
   0xd   :  { %29 = dma.hbm_to_vmem [thread:$0]  %s982_s2, 256, %s24_s22, [#allocation3], %s829_s24, %s829_s24, %s830_s25  }
   0xe   :  { %s831_s28 = smov [#allocation5]  }
   0xf   :  { %s37_s29 = sshll.u32 %s831_s28, 4  ;;  %s38_s29 = int_to_ptr.vmem [resolvable:$true] %s37_s29 }
  0x10   :  { %s790_s30 = scalar_lea.vmem %s38_s29, 512  ;;  %p795_p6 = scmp.lt.s32.totalorder %s38_s29, %s38_s29 }
  0x11   :  { %p791_p5 = scmp.ne.s32.totalorder %s38_s29, %s790_s30  ;;  %p796_p7 = scmp.lt.s32.totalorder %s790_s30, %s790_s30 }
  0x13   :  { %p797_p8 = por %p796_p7, %p795_p6 }
  0x15   :  { %p798_p9 = pnand %p797_p8, %p791_p5 }
  0x17   :  { %801 = shalt.err (!%p798_p9)
}
  0x18   :  { %43 = dma.hbm_to_vmem [thread:$0]  %s984_s4, 512, %s38_s29, [#allocation6], %s829_s24, %s829_s24, %s830_s25  }
  0x19   :  { %822 = dma.done.wait [#allocation3], 256  }
  0x1a   :  { %823 = vsyncadd [#allocation3], 4294967040 }
  0x1b   :  { %824 = dma.done.wait [#allocation6], 512  }
  0x1c   :  { %825 = vsyncadd [#allocation6], 4294966784  ;;  %v832_v0 = vmov 0.0   ;;  %vm833_vm0 = vmmov 0   ;;  %vm86_vm1 = vcmask 1046528   ;;  %v755_v3 = vld [vmem:[%s981_s1] sm:$0xff]   ;;  %v196_v14 = vlaneseq }
  0x1d   :  { %715 = vmatprep.subr.bf16.mxu1 %v832_v0  ;;  %719 = vmatprep.mubr.msk.bf16.mxu1 %vm833_vm0, %v832_v0  ;;  %v753_v1 = vld [vmem:[%s981_s1 + $0x8] sm:$0x7f]   ;;  %v756_v5 = vld [vmem:[%s980_s0] sm:$0xff]   ;;  %vm82_vm2 = vcmask 244736   ;;  %v760_v10 = vld [vmem:[#allocation5 + $0x8] sm:$0xff]   ;;  %vm402_vm3 = vcmask 523264  }
  0x1e   :  { %731 = vmatprep.subr.bf16.mxu0 %v832_v0  ;;  %739 = vmatprep.mubr.msk.bf16.mxu0 %vm833_vm0, %v832_v0  ;;  %v88_v2 = vsel %vm86_vm1, %v753_v1, 0  ;;  %v754_v4 = vld [vmem:[#allocation2 + $0x8] sm:$0x7f]   ;;  %v757_v7 = vld [vmem:[#allocation2] sm:$0xff]   ;;  %v761_v11 = vld [vmem:[#allocation5] sm:$0xff]   ;;  %v197_v16 = vshrl.u32 %v196_v14, 7 }
  0x1f   :  { %716 = vmatpush3.bf16.msra.mxu1 %v88_v2  ;;  %v147_v6 = vsel %vm86_vm1, %v754_v4, 0  ;;  %v758_v8 = vld [vmem:[#allocation5 + $0x18] sm:$0xff]   ;;  %v759_v9 = vld [vmem:[#allocation5 + $0x10] sm:$0xff]   ;;  %v834_v12 = vmov 1966171168   ;;  %vm578_vm4 = vcmask 1041409  }
  0x20   :  { %717 = vmatprep.subr.bf16.mxu1 %v832_v0  ;;  %732 = vmatpush3.bf16.msra.mxu0 %v758_v8  ;;  %v194_v13 = vunpack.c.l.s4 %v834_v12  ;;  %v690_v17 = vld [vmem:[%s983_s3] ss:$0 sm:$0xff]  ;;  %v894_v29 = vsub.s32 0, %v197_v16  ;;  %vm580_vm5 = vcmask 1042434   ;;  %vm582_vm6 = vcmask 1043459   ;;  %s835_s14 = smov [#allocation7]  }
  0x21   :  { %733 = vmatprep.subr.bf16.mxu0 %v832_v0  ;;  %vm584_vm7 = vcmask 1044484   ;;  %vm586_vm8 = vcmask 1045509   ;;  %vm588_vm9 = vcmask 1046534   ;;  %vm590_vm10 = vcmask 1047559   ;;  %s677_s15 = sshll.u32 %s835_s14, 4  ;;  %s678_s15 = int_to_ptr.vmem [resolvable:$true] %s677_s15 }
  0x22   :  { %v195_v15 = vunpack.c.0.s8 %v194_v13  ;;  %s802_s16 = scalar_lea.vmem %s678_s15, 256  ;;  %p807_p11 = scmp.lt.s32.totalorder %s678_s15, %s678_s15 }
  0x23   :  { %718 = vmatpush3.bf16.msra.mxu1 %v755_v3  ;;  %p803_p10 = scmp.ne.s32.totalorder %s678_s15, %s802_s16  ;;  %p808_p12 = scmp.lt.s32.totalorder %s802_s16, %s802_s16 }
  0x24   :  { %723 = vmatprep.subr.bf16.mxu1 %v832_v0  ;;  %734 = vmatpush3.bf16.msra.mxu0 %v759_v9  ;;  %v198_v18 = vsub.s32 %v195_v15, %v197_v16 }
  0x25   :  { %735 = vmatprep.subr.bf16.mxu0 %v832_v0  ;;  %p809_p13 = por %p808_p12, %p807_p11 }
  0x26   :  { %720 = vmatmul.mubr.msk.bf16.vlgmr.msra.gmra.mxu1 %vm82_vm2, %v756_v5 }
  0x27   :  { %724 = vmatpush3.bf16.msra.mxu1 %v147_v6  ;;  %727 = vmatprep.mubr.msk.bf16.mxu1 %vm833_vm0, %v832_v0  ;;  %p810_p0 = pnand %p809_p13, %p803_p10 }
  0x28   :  { %725 = vmatprep.subr.bf16.mxu1 %v832_v0  ;;  %736 = vmatpush3.bf16.msra.mxu0 %v760_v10 }
  0x29   :  { %737 = vmatprep.subr.bf16.mxu0 %v832_v0 }
  0x2b   :  { %726 = vmatpush3.bf16.msra.mxu1 %v757_v7 }
  0x2c   :  { %738 = vmatpush3.bf16.msra.mxu0 %v761_v11 }
  0x2e   :  { %728 = vmatmul.mubr.msk.bf16.vlgmr.msra.gmra.mxu1 %vm82_vm2, %v756_v5 }
  0xe6   :  { %v124_v19 = vpop.f32.mrf.mxu1 }
  0xe7   :  { %v125_v20 = vadd.f32 %v690_v17, %v124_v19 }
  0xe8   :  { %v721_v21 = vpop.f32.mrf.mxu1 }
  0xe9   :  { %v192_v22 = vcombine.high %v125_v20, %v125_v20  ;;  %v199_v23 = vrot.slane %v125_v20, %v198_v18 }
  0xea   :  { %v127_v24 = vpop.f32.mrf.mxu1 }
  0xeb   :  { %v206_v25 = vrot.slane %v192_v22, %v198_v18  ;;  %v207_v26 = vcombine.high %v199_v23, %v199_v23  ;;  %v215_v27 = vrot.slane %v199_v23, %v198_v18  ;;  %v128_v28 = vadd.f32 %v690_v17, %v127_v24 }
  0xec   :  { %v722_v30 = vpop.f32.mrf.mxu1 }
  0xed   :  { %v208_v31 = vcombine.high %v206_v25, %v206_v25  ;;  %v222_v32 = vrot.slane %v206_v25, %v198_v18  ;;  %v229_v33 = vrot.slane %v207_v26, %v198_v18  ;;  %v237_v34 = vcombine.high %v215_v27, %v215_v27 }
  0xee   :  { %v241_v35 = vcombine.high %v128_v28, %v128_v28  ;;  %v248_v36 = vrot.slane %v128_v28, %v198_v18  ;;  %v183_v37 = vpop.f32.mrf.mxu1  ;;  %v293_v40 = vrot.slane %v215_v27, %v894_v29 }
  0xef   :  { %v236_v38 = vrot.slane %v208_v31, %v198_v18  ;;  %v239_v39 = vcombine.high %v229_v33, %v229_v33  ;;  %v297_v41 = vrot.slane %v229_v33, %v894_v29  ;;  %v238_v45 = vcombine.high %v222_v32, %v222_v32 }
  0xf0   :  { %v255_v42 = vrot.slane %v241_v35, %v198_v18  ;;  %v256_v43 = vcombine.high %v248_v36, %v248_v36  ;;  %v729_v44 = vpop.f32.mrf.mxu1  ;;  %v301_v47 = vrot.slane %v237_v34, %v894_v29  ;;  %v264_v50 = vrot.slane %v248_v36, %v198_v18 }
  0xf1   :  { %v240_v46 = vcombine.high %v236_v38, %v236_v38  ;;  %v305_v48 = vrot.slane %v239_v39, %v894_v29  ;;  %v309_v54 = vrot.slane %v222_v32, %v894_v29  ;;  %v313_v55 = vrot.slane %v236_v38, %v894_v29 }
  0xf2   :  { %v257_v49 = vcombine.high %v255_v42, %v255_v42  ;;  %v271_v51 = vrot.slane %v255_v42, %v198_v18  ;;  %v278_v52 = vrot.slane %v256_v43, %v198_v18  ;;  %v900_v53 = vpop.f32.mrf.mxu1  ;;  %v370_v57 = vadd.f32 %v293_v40, %v183_v37 }
  0xf3   :  { %v371_v58 = vadd.f32 %v297_v41, %v183_v37  ;;  %v286_v60 = vcombine.high %v264_v50, %v264_v50  ;;  %v372_v61 = vadd.f32 %v301_v47, %v183_v37  ;;  %v373_v62 = vadd.f32 %v305_v48, %v183_v37 }
  0xf4   :  { %v285_v56 = vrot.slane %v257_v49, %v198_v18  ;;  %v730_v59 = vpop.f32.mrf.mxu1  ;;  %v317_v63 = vrot.slane %v238_v45, %v894_v29  ;;  %v321_v0 = vrot.slane %v240_v46, %v894_v29  ;;  %v287_v1 = vcombine.high %v271_v51, %v271_v51 }
  0xf5   :  { %v288_v2 = vcombine.high %v278_v52, %v278_v52  ;;  %v325_v3 = vrot.slane %v264_v50, %v894_v29  ;;  %v329_v4 = vrot.slane %v278_v52, %v894_v29  ;;  %v374_v5 = vadd.f32 %v309_v54, %v183_v37 }
  0xf6   :  { %v375_v6 = vadd.f32 %v313_v55, %v183_v37  ;;  %v289_v7 = vcombine.high %v285_v56, %v285_v56  ;;  %v341_v8 = vrot.slane %v271_v51, %v894_v29  ;;  %v386_v9 = vmax.f32 %v370_v57, 0.0 }
  0xf7   :  { %v387_v10 = vmax.f32 %v371_v58, 0.0  ;;  %v333_v11 = vrot.slane %v286_v60, %v894_v29  ;;  %v388_v12 = vmax.f32 %v372_v61, 0.0  ;;  %v389_v13 = vmax.f32 %v373_v62, 0.0 }
  0xf8   :  { %v390_v14 = vmax.f32 %v374_v5, 0.0  ;;  %v337_v15 = vrot.slane %v288_v2, %v894_v29  ;;  %v391_v16 = vmax.f32 %v375_v6, 0.0  ;;  %v403_v17 = vsel %vm402_vm3, %v386_v9, 0.0 }
  0xf9   :  { %v410_v18 = vsel %vm402_vm3, %v387_v10, 0.0  ;;  %v404_v19 = vrot.slane %v403_v17, 4  ;;  %v417_v21 = vsel %vm402_vm3, %v388_v12, 0.0  ;;  %v424_v22 = vsel %vm402_vm3, %v389_v13, 0.0 }
  0xfa   :  { %v411_v20 = vrot.slane %v410_v18, 4  ;;  %v345_v23 = vrot.slane %v285_v56, %v894_v29  ;;  %v418_v24 = vrot.slane %v417_v21, 4  ;;  %v425_v25 = vrot.slane %v424_v22, 4 }
  0xfb   :  { %v431_v26 = vsel %vm402_vm3, %v390_v14, 0.0  ;;  %v917_v27 = vadd.f32 %v317_v63, %v183_v37  ;;  %v919_v28 = vadd.f32 %v321_v0, %v183_v37  ;;  %v405_v30 = vadd.f32 %v404_v19, %v403_v17 }
  0xfc   :  { %v412_v31 = vadd.f32 %v411_v20, %v410_v18  ;;  %v349_v32 = vrot.slane %v287_v1, %v894_v29  ;;  %v432_v33 = vrot.slane %v431_v26, 4  ;;  %v378_v34 = vadd.f32 %v325_v3, %v900_v53 }
  0xfd   :  { %v379_v35 = vadd.f32 %v329_v4, %v900_v53  ;;  %v406_v36 = vrot.slane %v405_v30, 2  ;;  %v419_v38 = vadd.f32 %v418_v24, %v417_v21  ;;  %v438_v39 = vsel %vm402_vm3, %v391_v16, 0.0 }
  0xfe   :  { %v380_v40 = vadd.f32 %v333_v11, %v900_v53  ;;  %v413_v41 = vrot.slane %v412_v31, 2  ;;  %v426_v42 = vadd.f32 %v425_v25, %v424_v22  ;;  %v381_v37 = vadd.f32 %v337_v15, %v900_v53 }
  0xff   :  { %v382_v43 = vadd.f32 %v341_v8, %v900_v53  ;;  %v353_v44 = vrot.slane %v289_v7, %v894_v29  ;;  %v392_v45 = vmax.f32 %v917_v27, 0.0  ;;  %v393_v46 = vmax.f32 %v919_v28, 0.0 }
 0x100   :  { %v407_v47 = vadd.f32 %v406_v36, %v405_v30  ;;  %v433_v48 = vadd.f32 %v432_v33, %v431_v26  ;;  %v439_v49 = vrot.slane %v438_v39, 4  ;;  %v394_v50 = vmax.f32 %v378_v34, 0.0 }
 0x101   :  { %v395_v51 = vmax.f32 %v379_v35, 0.0  ;;  %v420_v52 = vrot.slane %v419_v38, 2  ;;  %v383_v54 = vadd.f32 %v345_v23, %v900_v53  ;;  %v396_v55 = vmax.f32 %v380_v40, 0.0 }
 0x102   :  { %v397_v56 = vmax.f32 %v381_v37, 0.0  ;;  %v414_v57 = vadd.f32 %v413_v41, %v412_v31  ;;  %v427_v58 = vrot.slane %v426_v42, 2  ;;  %v384_v59 = vadd.f32 %v349_v32, %v900_v53 }
 0x103   :  { %v398_v60 = vmax.f32 %v382_v43, 0.0  ;;  %v408_v29 = vrot.slane %v407_v47, 1  ;;  %v934_v61 = vadd.f32 %v353_v44, %v900_v53  ;;  %v459_v62 = vsel %vm402_vm3, %v394_v50, 0.0 }
 0x104   :  { %v466_v63 = vsel %vm402_vm3, %v395_v51, 0.0  ;;  %v460_v0 = vrot.slane %v459_v62, 4  ;;  %v473_v2 = vsel %vm402_vm3, %v396_v55, 0.0  ;;  %v480_v3 = vsel %vm402_vm3, %v397_v56, 0.0 }
 0x105   :  { %v467_v1 = vrot.slane %v466_v63, 4  ;;  %v399_v4 = vmax.f32 %v383_v54, 0.0  ;;  %v474_v5 = vrot.slane %v473_v2, 4  ;;  %v481_v6 = vrot.slane %v480_v3, 4 }
 0x106   :  { %v487_v7 = vsel %vm402_vm3, %v398_v60, 0.0  ;;  %v415_v8 = vrot.slane %v414_v57, 1  ;;  %v421_v9 = vadd.f32 %v420_v52, %v419_v38  ;;  %v461_v10 = vadd.f32 %v460_v0, %v459_v62 }
 0x107   :  { %v468_v53 = vadd.f32 %v467_v1, %v466_v63  ;;  %v400_v11 = vmax.f32 %v384_v59, 0.0  ;;  %v401_v12 = vmax.f32 %v934_v61, 0.0  ;;  %v475_v13 = vadd.f32 %v474_v5, %v473_v2 }
 0x108   :  { %v482_v14 = vadd.f32 %v481_v6, %v480_v3  ;;  %v462_v15 = vrot.slane %v461_v10, 2  ;;  %v488_v17 = vrot.slane %v487_v7, 4  ;;  %v434_v18 = vrot.slane %v433_v48, 2 }
 0x109   :  { %v469_v16 = vrot.slane %v468_v53, 2  ;;  %v942_v19 = vadd.f32 %v408_v29, %v407_v47  ;;  %v476_v20 = vrot.slane %v475_v13, 2  ;;  %v494_v22 = vsel %vm402_vm3, %v399_v4, 0.0 }
 0x10a   :  { %v483_v21 = vrot.slane %v482_v14, 2  ;;  %v463_v23 = vadd.f32 %v462_v15, %v461_v10  ;;  %v422_v24 = vrot.slane %v421_v9, 1  ;;  %v428_v25 = vadd.f32 %v427_v58, %v426_v42 }
 0x10b   :  { %v440_v26 = vadd.f32 %v439_v49, %v438_v39  ;;  %v470_v27 = vadd.f32 %v469_v16, %v468_v53  ;;  %v435_v28 = vadd.f32 %v434_v18, %v433_v48  ;;  %v445_v30 = vsel %vm402_vm3, %v392_v45, 0.0 }
 0x10c   :  { %v452_v31 = vsel %vm402_vm3, %v393_v46, 0.0  ;;  %v477_v32 = vadd.f32 %v476_v20, %v475_v13  ;;  %v489_v33 = vadd.f32 %v488_v17, %v487_v7  ;;  %v495_v34 = vrot.slane %v494_v22, 4 }
 0x10d   :  { %v441_v35 = vrot.slane %v440_v26, 2  ;;  %v947_v36 = vadd.f32 %v415_v8, %v414_v57  ;;  %v446_v38 = vrot.slane %v445_v30, 4  ;;  %v453_v40 = vrot.slane %v452_v31, 4 }
 0x10e   :  { %v484_v41 = vadd.f32 %v483_v21, %v482_v14  ;;  %v464_v37 = vrot.slane %v463_v23, 1  ;;  %v949_v43 = vadd.f32 %v422_v24, %v421_v9  ;;  %v429_v42 = vrot.slane %v428_v25, 1 }
 0x10f   :  { %v442_v39 = vadd.f32 %v441_v35, %v440_v26  ;;  %v471_v44 = vrot.slane %v470_v27, 1  ;;  %v436_v47 = vrot.slane %v435_v28, 1  ;;  %v447_v48 = vadd.f32 %v446_v38, %v445_v30 }
 0x110   :  { %v454_v45 = vadd.f32 %v453_v40, %v452_v31  ;;  %v478_v49 = vrot.slane %v477_v32, 1  ;;  %v490_v46 = vrot.slane %v489_v33, 2  ;;  %v496_v50 = vadd.f32 %v495_v34, %v494_v22 }
 0x111   :  { %v501_v51 = vsel %vm402_vm3, %v400_v11, 0.0  ;;  %v448_v52 = vrot.slane %v447_v48, 2  ;;  %v485_v55 = vrot.slane %v484_v41, 1  ;;  %v443_v57 = vrot.slane %v442_v39, 1 }
 0x112   :  { %v455_v54 = vrot.slane %v454_v45, 2  ;;  %v502_v56 = vrot.slane %v501_v51, 4  ;;  %v491_v58 = vadd.f32 %v490_v46, %v489_v33  ;;  %v497_v59 = vrot.slane %v496_v50, 2 }
 0x113   :  { %v508_v60 = vsel %vm402_vm3, %v401_v12, 0.0  ;;  %v449_v29 = vadd.f32 %v448_v52, %v447_v48  ;;  %v465_v0 = vadd.f32 %v464_v37, %v463_v23  ;;  %v430_v1 = vadd.f32 %v429_v42, %v428_v25 }
 0x114   :  { %v456_v61 = vadd.f32 %v455_v54, %v454_v45  ;;  %v503_v62 = vadd.f32 %v502_v56, %v501_v51  ;;  %v509_v63 = vrot.slane %v508_v60, 4  ;;  %v492_v2 = vrot.slane %v491_v58, 1 }
 0x115   :  { %v498_v3 = vadd.f32 %v497_v59, %v496_v50  ;;  %v472_v4 = vadd.f32 %v471_v44, %v470_v27  ;;  %v437_v5 = vadd.f32 %v436_v47, %v435_v28  ;;  %v450_v8 = vrot.slane %v449_v29, 1 }
 0x116   :  { %v504_v6 = vrot.slane %v503_v62, 2  ;;  %v510_v7 = vadd.f32 %v509_v63, %v508_v60  ;;  %v479_v9 = vadd.f32 %v478_v49, %v477_v32  ;;  %v486_v10 = vadd.f32 %v485_v55, %v484_v41 }
 0x117   :  { %v499_v53 = vrot.slane %v498_v3, 1  ;;  %v444_v11 = vadd.f32 %v443_v57, %v442_v39  ;;  %v457_v12 = vrot.slane %v456_v61, 1  ;;  %v493_v15 = vadd.f32 %v492_v2, %v491_v58 }
 0x118   :  { %v505_v13 = vadd.f32 %v504_v6, %v503_v62  ;;  %v511_v14 = vrot.slane %v510_v7, 2  ;;  %v515_v16 = vpack.c.bf16 %v942_v19, %v942_v19  ;;  %v516_v17 = vpack.c.bf16 %v947_v36, %v947_v36 }
 0x119   :  { %v517_v18 = vpack.c.bf16 %v949_v43, %v949_v43  ;;  %v500_v20 = vadd.f32 %v499_v53, %v498_v3  ;;  %v518_v23 = vpack.c.bf16 %v430_v1, %v430_v1  ;;  %v451_v24 = vadd.f32 %v450_v8, %v449_v29  ;;  %v698_v8 = vld [vmem:[%s985_s5] ss:$0 sm:$0xff] }
 0x11a   :  { %v506_v21 = vrot.slane %v505_v13, 1  ;;  %v512_v22 = vadd.f32 %v511_v14, %v510_v7  ;;  %v523_v25 = vpack.c.bf16 %v465_v0, %v465_v0  ;;  %v524_v26 = vpack.c.bf16 %v472_v4, %v472_v4 }
 0x11b   :  { %v525_v27 = vpack.c.bf16 %v479_v9, %v479_v9  ;;  %v458_v28 = vadd.f32 %v457_v12, %v456_v61  ;;  %v526_v31 = vpack.c.bf16 %v486_v10, %v486_v10  ;;  %v519_v32 = vpack.c.bf16 %v437_v5, %v437_v5 }
 0x11c   :  { %v507_v30 = vadd.f32 %v506_v21, %v505_v13  ;;  %v513_v19 = vrot.slane %v512_v22, 1  ;;  %v520_v33 = vpack.c.bf16 %v444_v11, %v444_v11  ;;  %v527_v34 = vpack.c.bf16 %v493_v15, %v493_v15 }
 0x11d   :  { %v563_v35 = vunpack.c.l.b16 %v516_v17  ;;  %v528_v38 = vpack.c.bf16 %v500_v20, %v500_v20  ;;  %v562_v40 = vunpack.c.l.b16 %v515_v16  ;;  %v564_v41 = vunpack.c.l.b16 %v517_v18 }
 0x11e   :  { %v514_v36 = vadd.f32 %v513_v19, %v512_v22  ;;  %v565_v37 = vunpack.c.l.b16 %v518_v23  ;;  %v570_v43 = vunpack.c.l.b16 %v523_v25  ;;  %v571_v42 = vunpack.c.l.b16 %v524_v26 }
 0x11f   :  { %v572_v39 = vunpack.c.l.b16 %v525_v27  ;;  %v521_v44 = vpack.c.bf16 %v451_v24, %v451_v24  ;;  %v529_v47 = vpack.c.bf16 %v507_v30, %v507_v30  ;;  %v573_v48 = vunpack.c.l.b16 %v526_v31 }
 0x120   :  { %v522_v45 = vpack.c.bf16 %v458_v28, %v458_v28  ;;  %v530_v49 = vpack.c.bf16 %v514_v36, %v514_v36  ;;  %v579_v46 = vsel %vm578_vm4, %v563_v35, %v562_v40  ;;  %v592_v50 = vsel %vm578_vm4, %v571_v42, %v570_v43 }
 0x121   :  { %v566_v51 = vunpack.c.l.b16 %v519_v32  ;;  %v574_v52 = vunpack.c.l.b16 %v527_v34  ;;  %v581_v54 = vsel %vm580_vm5, %v564_v41, %v579_v46  ;;  %v593_v55 = vsel %vm580_vm5, %v572_v39, %v592_v50 }
 0x122   :  { %v567_v56 = vunpack.c.l.b16 %v520_v33  ;;  %v575_v57 = vunpack.c.l.b16 %v528_v38  ;;  %v583_v58 = vsel %vm582_vm6, %v565_v37, %v581_v54  ;;  %v594_v59 = vsel %vm582_vm6, %v573_v48, %v593_v55 }
 0x123   :  { %v568_v60 = vunpack.c.l.b16 %v521_v44  ;;  %v576_v29 = vunpack.c.l.b16 %v529_v47  ;;  %v585_v61 = vsel %vm584_vm7, %v566_v51, %v583_v58  ;;  %v595_v62 = vsel %vm584_vm7, %v574_v52, %v594_v59 }
 0x124   :  { %v569_v63 = vunpack.c.l.b16 %v522_v45  ;;  %v577_v0 = vunpack.c.l.b16 %v530_v49  ;;  %v587_v1 = vsel %vm586_vm8, %v567_v56, %v585_v61  ;;  %v596_v2 = vsel %vm586_vm8, %v575_v57, %v595_v62 }
 0x125   :  { %v589_v3 = vsel %vm588_vm9, %v568_v60, %v587_v1  ;;  %v597_v4 = vsel %vm588_vm9, %v576_v29, %v596_v2 }
 0x126   :  { %v591_v5 = vsel %vm590_vm10, %v569_v63, %v589_v3  ;;  %v598_v6 = vsel %vm590_vm10, %v577_v0, %v597_v4 }
 0x127   :  { %v599_v7 = vpack.c.b16 %v598_v6, %v591_v5 }
 0x129   :  { %740 = vmatmul.mubr.msk.bf16.vlgmr.msra.gmra.mxu0 %vm402_vm3, %v599_v7 }
 0x1e9   :  { %v661_v9 = vpop.f32.mrf.mxu0 }
 0x1ea   :  { %v662_v10 = vadd.f32 %v698_v8, %v661_v9 }
 0x1eb   :  { %v741_v53 = vpop.f32.mrf.mxu0 }
 0x1ec   :  { %v668_v11 = vmax.f32 %v662_v10, 0.0 }
 0x1ed   :  { %v664_v12 = vpop.f32.mrf.mxu0 }
 0x1ee   :  { %670 = vst [vmem:[#allocation7] sm:$0xff] %v668_v11  ;;  %v665_v13 = vadd.f32 %v698_v8, %v664_v12 }
 0x1ef   :  { %v742_v14 = vpop.f32.mrf.mxu0 }
 0x1f0   :  { %v669_v15 = vmax.f32 %v665_v13, 0.0 }
 0x1f2   :  { %671 = vst [vmem:[#allocation7 + $0x8] sm:$0xff] %v669_v15 }
 0x1f3   :  { %813 = shalt.err (!%p810_p0)
}
 0x1f4   :  { %s836_s5 = smov 128   ;;  %s837_s17 = smov 8  }
 0x1f5   :  { %683 = dma.vmem_to_hbm [thread:$0]  %s678_s15, 256, %s986_s6, [#allocation4], %s836_s5, %s836_s5, %s837_s17  }
 0x1f6   :  { %826 = dma.done.wait [#allocation4], 256  }
 0x1f7   :  { %827 = vsyncadd [#allocation4], 4294967040 }
 0x1f8   :  { %687 = vsyncpa [#allocation3], 1 }
 0x1f9   :  { %688 = vsyncpa [#allocation6], 1 }
 0x1fa   :  { %689 = vsyncpa [#allocation4], 1 }

</bundles_post_ra>
